<compile_context>
chip_gen: v7x
topology: tpu7x:2x2x1
jax: 0.10.0
libtpu: 0.0.40
codegen_flags: <defaults>
</compile_context>

<pallas_src>
import functools

import jax
import jax.numpy as jnp
from jax import lax
from jax.experimental import pallas as pl
from jax.experimental.pallas import tpu as pltpu


def _prl_kernel(x_ref, o_ref, *, h, w, rows_per_block, total_rows, mask_rows):
    """x_ref: (ROWS, h*w) block; o_ref: (8, 128) per-block partial-sum tile."""
    x = x_ref[...].astype(jnp.float32)                 # (ROWS, h*w)
    hw = h * w

    if mask_rows:
        # Ragged boundary block: rows past total_rows contain undefined data
        # (we deliberately do NOT pad in HBM).  Zero them -> their vertical
        # diffs are 0 -> smooth-L1 contribution is exactly 0.
        row0 = pl.program_id(0) * rows_per_block
        rows = row0 + lax.broadcasted_iota(jnp.int32, x.shape, 0)
        x = jnp.where(rows < total_rows, x, jnp.float32(0.0))

    # Vertical difference: logits[..., i, :] - logits[..., i+1, :] is a static
    # lane-shift by w in the flattened (h*w) layout.
    a = x[:, : (h - 1) * w]
    b = x[:, w:hw]
    d = a - b
    ad = jnp.abs(d)
    sl1 = jnp.where(ad < 1.0, 0.5 * d * d, ad - 0.5)   # smooth L1, beta=1, target 0
    s = jnp.sum(sl1)

    # Place the block's partial sum at [0, 0] of a full, lane-dense (8, 128)
    # output tile (all other entries exactly 0): unmasked full-tile store and
    # no serializing shared accumulator across grid steps.
    row = lax.broadcasted_iota(jnp.int32, (8, 128), 0)
    col = lax.broadcasted_iota(jnp.int32, (8, 128), 1)
    o_ref[...] = jnp.where((row == 0) & (col == 0), s, jnp.float32(0.0))


def parsing_relation_loss(logits):
    n, c, h, w = logits.shape
    assert h >= 2, "need at least 2 rows"
    hw = h * w
    r = n * c
    itemsize = jnp.dtype(logits.dtype).itemsize

    # Lane-dense layout: (n, c, h, w) -> (n*c, h*w); contiguous, so this is free.
    x2 = logits.reshape(r, hw)

    # Rows per block: ~4 MiB per block (double-buffered ~8 MiB), a multiple of 8
    # (sublane alignment), and not bigger than the (8-rounded) data.
    target_block_bytes = 4 * 1024 * 1024
    rows_per_block = max(8, (target_block_bytes // (hw * itemsize)) // 8 * 8)
    rows_per_block = int(min(rows_per_block, pl.cdiv(r, 8) * 8))
    num_blocks = int(pl.cdiv(r, rows_per_block))
    mask_rows = (r % rows_per_block) != 0

    block_bytes = rows_per_block * hw * itemsize
    vmem_limit = int(max(32 * 1024 * 1024, 2 * block_bytes + 4 * 1024 * 1024))
    # TODO(synk): if h*w alone is so large that an 8-row block overflows VMEM,
    # add lane-dim blocking with a w-wide halo; not needed for typical shapes.

    kernel = functools.partial(
        _prl_kernel, h=h, w=w, rows_per_block=rows_per_block,
        total_rows=r, mask_rows=mask_rows)
    count = (h - 1) * n * c * w

    partials = pl.pallas_call(
        kernel,
        out_shape=jax.ShapeDtypeStruct((num_blocks * 8, 128), jnp.float32),
        grid_spec=pltpu.PrefetchScalarGridSpec(
            num_scalar_prefetch=0,
            grid=(num_blocks,),
            in_specs=[pl.BlockSpec((rows_per_block, hw), lambda i: (i, 0))],
            out_specs=pl.BlockSpec((8, 128), lambda i: (i, 0)),
        ),
        compiler_params=pltpu.CompilerParams(
            # Independent per-block partials -> grid axis can be parallel
            # (usable by both TensorCores on v7x; harmless on v5e/v6e).
            dimension_semantics=("parallel",),
            vmem_limit_bytes=vmem_limit,
        ),
        cost_estimate=pl.CostEstimate(
            flops=5 * count,
            transcendentals=0,
            bytes_accessed=int(r * hw * itemsize + num_blocks * 8 * 128 * 4),
        ),
    )(x2)

    return jnp.sum(partials) / jnp.float32(count)


def _reference(logits):
    # Pure-JAX reference mirroring the PyTorch forward.
    d = logits[:, :, :-1, :] - logits[:, :, 1:, :]
    d = d.astype(jnp.float32)
    ad = jnp.abs(d)
    sl1 = jnp.where(ad < 1.0, 0.5 * d * d, ad - 0.5)
    return jnp.mean(sl1)


if __name__ == "__main__":
    key = jax.random.PRNGKey(0)
    # Small shape consistent with the module's (n, c, h, w) input.
    x = jax.random.normal(key, (2, 4, 16, 16), dtype=jnp.float32)

    loss = jax.block_until_ready(parsing_relation_loss(x))
    ref = jax.block_until_ready(_reference(x))

    assert jnp.allclose(loss, ref, rtol=1e-5, atol=1e-6), (loss, ref)
    print("KERNEL_OK")
</pallas_src>

<mosaic_0001>
module attributes {stable_mosaic.version = 11 : i64} {
  func.func @_prl_kernel(%arg0: i32, %arg1: memref<8x256xf32, #tpu.memory_space<vmem>>, %arg2: memref<8x128xf32, #tpu.memory_space<vmem>>) attributes {dimension_semantics = [#tpu.dimension_semantics<parallel>], iteration_bounds = array<i64: 1>, scalar_prefetch = 0 : i64, scratch_operands = 0 : i64, tpu.core_type = #tpu.core_type<tc>, window_params = [{transform_indices = @transform_0, window_bounds = array<i64: 8, 256>}, {transform_indices = @transform_1, window_bounds = array<i64: 8, 128>}]} {
    %c0 = arith.constant 0 : index
    %c0_0 = arith.constant 0 : index
    %0 = vector.load %arg1[%c0, %c0_0] : memref<8x256xf32, #tpu.memory_space<vmem>>, vector<8x256xf32>
    %1 = vector.extract_strided_slice %0 {offsets = [0, 0], sizes = [8, 240], strides = [1, 1]} : vector<8x256xf32> to vector<8x240xf32>
    %2 = vector.extract_strided_slice %0 {offsets = [0, 16], sizes = [8, 240], strides = [1, 1]} : vector<8x256xf32> to vector<8x240xf32>
    %3 = arith.subf %1, %2 : vector<8x240xf32>
    %4 = math.absf %3 : vector<8x240xf32>
    %cst = arith.constant 1.000000e+00 : f32
    %5 = vector.broadcast %cst : f32 to vector<8x240xf32>
    %6 = arith.cmpf olt, %4, %5 : vector<8x240xf32>
    %cst_1 = arith.constant 5.000000e-01 : f32
    %7 = vector.broadcast %cst_1 : f32 to vector<8x240xf32>
    %8 = arith.mulf %7, %3 : vector<8x240xf32>
    %9 = arith.mulf %8, %3 : vector<8x240xf32>
    %cst_2 = arith.constant 5.000000e-01 : f32
    %10 = vector.broadcast %cst_2 : f32 to vector<8x240xf32>
    %11 = arith.subf %4, %10 : vector<8x240xf32>
    %12 = arith.select %6, %9, %11 : vector<8x240xi1>, vector<8x240xf32>
    %13 = vector.shape_cast %12 : vector<8x240xf32> to vector<1x8x240xf32>
    %cst_3 = arith.constant dense<0.000000e+00> : vector<1xf32>
    %14 = vector.multi_reduction <add>, %13, %cst_3 [1, 2] : vector<1x8x240xf32> to vector<1xf32>
    %15 = vector.shape_cast %14 : vector<1xf32> to vector<1x1x1xf32>
    %16 = vector.extract %15[0, 0, 0] : f32 from vector<1x1x1xf32>
    %17 = tpu.iota {dimensions = array<i32: 0>} : vector<8x128xi32>
    %18 = tpu.iota {dimensions = array<i32: 1>} : vector<8x128xi32>
    %c0_i32 = arith.constant 0 : i32
    %19 = vector.broadcast %c0_i32 : i32 to vector<8x128xi32>
    %20 = arith.cmpi eq, %17, %19 : vector<8x128xi32>
    %c0_i32_4 = arith.constant 0 : i32
    %21 = vector.broadcast %c0_i32_4 : i32 to vector<8x128xi32>
    %22 = arith.cmpi eq, %18, %21 : vector<8x128xi32>
    %23 = arith.andi %20, %22 : vector<8x128xi1>
    %cst_5 = arith.constant 0.000000e+00 : f32
    %24 = vector.broadcast %16 : f32 to vector<8x128xf32>
    %25 = vector.broadcast %cst_5 : f32 to vector<8x128xf32>
    %26 = arith.select %23, %24, %25 : vector<8x128xi1>, vector<8x128xf32>
    %c0_6 = arith.constant 0 : index
    %c0_7 = arith.constant 0 : index
    %27 = vector.load %arg2[%c0_6, %c0_7] : memref<8x128xf32, #tpu.memory_space<vmem>>, vector<8x128xf32>
    tpu.vector_store %arg2[%c0_6, %c0_7], %26 {strides = array<i32>} : memref<8x128xf32, #tpu.memory_space<vmem>>, vector<8x128xf32>,
    return
  }
  func.func @transform_0(%arg0: i32) -> (i32, i32) {
    %c0_i32 = arith.constant 0 : i32
    %c0_i32_0 = arith.constant 0 : i32
    return %arg0, %c0_i32 : i32, i32
  }
  func.func @transform_1(%arg0: i32) -> (i32, i32) {
    %c0_i32 = arith.constant 0 : i32
    %c0_i32_0 = arith.constant 0 : i32
    return %arg0, %c0_i32 : i32, i32
  }
}

</mosaic_0001>

<bundles_post_ra>
// kernel: tpu_custom_call.1
= control target key start
LH: loop header
LB: loop body
LE: loop exit
PB: predicated region body
PF: predicated region fallthrough
CT: control target
= control target key end

     0   :  { %6 = vsyncpa [#allocation3], 0  ;;  %s177_s0 = inlined_call_operand.hbm [shape: f32[8,256], index: 0, kind: input, shape index: {}]   ;;  %s178_s1 = inlined_call_operand.hbm [shape: f32[8,128], index: 1, kind: output, shape index: {}]  }
   0x1   :  { %7 = vsyncpa [#allocation4], 0  ;;  %s138_s6 = smov [#allocation2]   ;;  %s90_s10 = scalar_lea.hbm %s177_s0, 256 }
   0x2   :  { %s14_s7 = sshll.u32 %s138_s6, 4  ;;  %p91_p0 = scmp.ne.s32.totalorder %s177_s0, %s90_s10  ;;  %s15_s7 = int_to_ptr.vmem [resolvable:$true] %s14_s7 }
   0x3   :  { %p94_p1 = scmp.lt.u32.totalorder %s90_s10, %s177_s0 }
   0x5   :  { %p96_p2 = pnand %p94_p1, %p91_p0 }
   0x7   :  { %99 = shalt.err (!%p96_p2)
}
   0x8   :  { %s100_s15 = scalar_lea.vmem %s15_s7, 256  ;;  %p105_p4 = scmp.lt.s32.totalorder %s15_s7, %s15_s7 }
   0x9   :  { %p101_p3 = scmp.ne.s32.totalorder %s15_s7, %s100_s15  ;;  %p106_p5 = scmp.lt.s32.totalorder %s100_s15, %s100_s15 }
   0xb   :  { %p107_p6 = por %p106_p5, %p105_p4 }
   0xd   :  { %p108_p7 = pnand %p107_p6, %p101_p3 }
   0xf   :  { %111 = shalt.err (!%p108_p7)
}
  0x10   :  { %17 = dma.hbm_to_vmem [thread:$0]  %s177_s0, 256, %s15_s7, [#allocation3]  }
  0x11   :  { %134 = dma.done.wait [#allocation3], 256  }
  0x12   :  { %135 = vsyncadd [#allocation3], 4294967040  ;;  %v21_v0 = vld [vmem:[#allocation2] sm:$0xff]  ;;  %s139_s18 = smov 112   ;;  %v22_v1 = vld [vmem:[#allocation2 + $0x8] sm:$0xff]  ;;  %vm29_vm0 = vcmask 916480   ;;  %v58_v26 = vlaneseq }
  0x13   :  { %25 = vrot.lane.b32.xlu0 %v21_v0, %s139_s18  ;;  %s140_s0 = smov [#allocation5]  }
  0x14   :  { %v59_v27 = vshrl.u32 %v58_v26, 7  ;;  %v61_v28 = vand.u32 127, %v58_v26  ;;  %s74_s19 = sshll.u32 %s140_s0, 4  ;;  %s75_s19 = int_to_ptr.vmem [resolvable:$true] %s74_s19 }
  0x15   :  { %s112_s21 = scalar_lea.vmem %s75_s19, 128  ;;  %p117_p9 = scmp.lt.s32.totalorder %s75_s19, %s75_s19 }
  0x16   :  { %vm62_vm3 = vcmp.eq.s32.totalorder %v59_v27, 0  ;;  %vm63_vm4 = vcmp.eq.s32.totalorder %v61_v28, 0  ;;  %p113_p8 = scmp.ne.s32.totalorder %s75_s19, %s112_s21  ;;  %p118_p10 = scmp.lt.s32.totalorder %s112_s21, %s112_s21 }
  0x17   :  { %27 = vrot.lane.b32.xlu0 %v22_v1, %s139_s18  ;;  %vm64_vm5 = vmand %vm62_vm3, %vm63_vm4 }
  0x18   :  { %p119_p11 = por %p118_p10, %p117_p9 }
  0x1a   :  { %p120_p12 = pnand %p119_p11, %p113_p8 }
  0x85   :  { %v26_v2 = vpop.permute.xlu0 %25 }
  0x89   :  { %v28_v3 = vpop.permute.xlu0 %27 }
  0x8a   :  { %v30_v4 = vsel %vm29_vm0, %v26_v2, %v28_v3  ;;  %v34_v5 = vsub.f32 %v22_v1, %v28_v3 }
  0x8b   :  { %v33_v6 = vsub.f32 %v21_v0, %v30_v4 }
  0x8c   :  { %v36_v7 = vand.u32 2147483647, %v34_v5  ;;  %v40_v8 = vmul.f32 0.5, %v34_v5 }
  0x8d   :  { %v39_v9 = vmul.f32 0.5, %v33_v6  ;;  %v35_v10 = vand.u32 2147483647, %v33_v6 }
  0x8e   :  { %v42_v11 = vmul.f32 %v40_v8, %v34_v5  ;;  %vm38_vm1 = vcmp.lt.f32.partialorder %v36_v7, 1.0  ;;  %v84_v12 = vadd.f32 -0.5, %v36_v7 }
  0x8f   :  { %vm37_vm2 = vcmp.lt.f32.partialorder %v35_v10, 1.0  ;;  %v41_v13 = vmul.f32 %v39_v9, %v33_v6  ;;  %v83_v14 = vadd.f32 -0.5, %v35_v10 }
  0x90   :  { %v46_v15 = vsel %vm38_vm1, %v42_v11, %v84_v12 }
  0x91   :  { %v45_v16 = vsel %vm37_vm2, %v41_v13, %v83_v14  ;;  %v47_v17 = vsel %vm29_vm0, %v46_v15, 0.0 }
  0x92   :  { %v48_v18 = vadd.f32 %v47_v17, %v45_v16 }
  0x94   :  { %49 = vadd.xlane.f32.xlu1 %v48_v18 }
 0x121   :  { %v50_v19 = vpop.xlane.xlu1 %49 }
 0x122   :  { %v51_v20 = vrot.slane %v50_v19, 4 }
 0x124   :  { %v52_v21 = vadd.f32 %v51_v20, %v50_v19 }
 0x126   :  { %v53_v22 = vrot.slane %v52_v21, 2 }
 0x128   :  { %v54_v23 = vadd.f32 %v53_v22, %v52_v21 }
 0x12a   :  { %v55_v24 = vrot.slane %v54_v23, 1 }
 0x12c   :  { %v56_v25 = vadd.f32 %v55_v24, %v54_v23 }
 0x12e   :  { %85 = vpush %v56_v25 }
 0x15f   :  { %s86_s20 = spop %85 }
 0x160   :  { %v65_v29 = vstv %s86_s20 }
 0x161   :  { %v66_v30 = vsel %vm64_vm5, %v65_v29, 0.0 }
 0x162   :  { %67 = vst [vmem:[#allocation5] sm:$0xff] %v66_v30 }
 0x163   :  { %123 = shalt.err (!%p120_p12)
}
 0x164   :  { %s124_s24 = scalar_lea.hbm %s178_s1, 128 }
 0x165   :  { %p125_p13 = scmp.ne.s32.totalorder %s178_s1, %s124_s24  ;;  %p128_p0 = scmp.lt.u32.totalorder %s124_s24, %s178_s1 }
 0x167   :  { %p130_p1 = pnand %p128_p0, %p125_p13 }
 0x169   :  { %133 = shalt.err (!%p130_p1)
}
 0x16a   :  { %77 = dma.vmem_to_hbm [thread:$0]  %s75_s19, 128, %s178_s1, [#allocation4]  }
 0x16b   :  { %136 = dma.done.wait [#allocation4], 128  }
 0x16c   :  { %137 = vsyncadd [#allocation4], 4294967168 }
 0x16d   :  { %81 = vsyncpa [#allocation3], 1 }
 0x16e   :  { %82 = vsyncpa [#allocation4], 1 }

</bundles_post_ra>
